<compile_context>
chip_gen: v6e
topology: v6e:2x2x1
jax: 0.10.0
libtpu: 0.0.40
codegen_flags: <defaults>
</compile_context>

<pallas_src>
import functools

import jax
import jax.numpy as jnp
from jax.experimental import pallas as pl
from jax.experimental.pallas import tpu as pltpu


def _round_up(x, m):
    return ((x + m - 1) // m) * m


def _vmem_budget_bytes():
    """Generation-aware VMEM cap: ~48 MiB on v7x (64 MiB phys), ~96 MiB on v5e/v6e."""
    cap = 128 << 20
    try:
        info = pltpu.get_tpu_info()
        cap = int(getattr(info, "vmem_capacity_bytes", cap))
    except Exception:
        pass
    return (48 << 20) if cap <= (64 << 20) else (96 << 20)


def _pick_m(M, sub32):
    """Padded M and row-tile tm.  Only split M for genuinely large batches."""
    align = 16 if sub32 else 8  # bf16 packs 2 rows / sublane -> keep tm a multiple of 16
    if M >= 1024:
        tm = 512
        return _round_up(M, tm), tm
    if M >= 512:
        tm = 256
        return _round_up(M, tm), tm
    Mp = _round_up(M, align)
    return Mp, Mp


def _pick_kn(K, N, sub32):
    """Padded K/N and panel tiles tk/tn (independent of the batch size)."""
    align = 16 if sub32 else 8
    # N (lane) : pad to a multiple of 128 -> unmasked stores, full MXU columns.
    Np = _round_up(N, 128)
    if Np > 1024:
        tn = 512
        Np = _round_up(N, tn)
    else:
        tn = Np
    # K (reduction): big panels cut accumulator VMEM round-trips and step overhead.
    tk_cap = 2048 if sub32 else 1024
    Kp = _round_up(K, align)
    if Kp > tk_cap:
        tk = tk_cap               # multiple of 128 -> legal X lane dim when K is split
        Kp = _round_up(K, tk)
    else:
        tk = Kp                   # full-K panel: block dim == array dim, no constraint
    return Kp, Np, tk, tn


def _dense_kernel(x_ref, w_ref, b_ref, o_ref, *, activation):
    """One (tm, tn) output tile; trailing K grid axis accumulates into o_ref."""
    k = pl.program_id(2)

    @pl.when(k == 0)
    def _():
        o_ref[...] = jnp.zeros_like(o_ref)

    # MXU panel matmul with f32 accumulation directly into the k-invariant,
    # VMEM-resident output tile (no separate accumulator scratch).
    o_ref[...] += jnp.dot(x_ref[...], w_ref[...], preferred_element_type=jnp.float32)

    @pl.when(k == pl.num_programs(2) - 1)
    def _():
        s = o_ref[...] + b_ref[...]            # (tm,tn) + (1,tn) broadcast (VPU)
        if activation == "tanh":
            s = jnp.tanh(s)                    # EUP slot (overlaps with MXU)
        elif activation == "relu":
            s = jnp.maximum(s, 0.0)            # VPU
        o_ref[...] = s


def _dense_matmul(xp, wp, bp, tm, tk, tn, *, activation, w_buffers, logical_shape):
    Mp, Kp = xp.shape
    _, Np = wp.shape
    M, K, N = logical_shape
    esize = jnp.dtype(xp.dtype).itemsize

    # Double-buffered X / W panels, double-buffered f32 output tile, bias; 2x margin.
    vmem_bytes = (
        2 * tm * tk * esize
        + max(w_buffers, 2) * tk * tn * esize
        + 2 * tm * tn * 4
        + 2 * tn * 4
    )
    vmem_limit = int(min(max(2 * vmem_bytes, 8 << 20), _vmem_budget_bytes()))

    cost = pl.CostEstimate(
        flops=2 * M * K * N,
        transcendentals=(M * N) if activation == "tanh" else 0,
        bytes_accessed=esize * (M * K + K * N) + 4 * (N + M * N),
    )

    w_spec_kwargs = {}
    if w_buffers != 2:
        # Deeper pipeline on the W stream if profiling shows exposed DMA.
        w_spec_kwargs["pipeline_mode"] = pl.Buffered(w_buffers)

    kernel = functools.partial(_dense_kernel, activation=activation)

    return pl.pallas_call(
        kernel,
        out_shape=jax.ShapeDtypeStruct((Mp, Np), jnp.float32),
        grid_spec=pltpu.PrefetchScalarGridSpec(
            num_scalar_prefetch=0,
            grid=(Mp // tm, Np // tn, Kp // tk),
            in_specs=[
                pl.BlockSpec((tm, tk), lambda i, j, k: (i, k)),                  # X panel
                pl.BlockSpec((tk, tn), lambda i, j, k: (k, j), **w_spec_kwargs), # W panel
                pl.BlockSpec((1, tn), lambda i, j, k: (0, j)),                   # bias slice
            ],
            out_specs=pl.BlockSpec((tm, tn), lambda i, j, k: (i, j)),
        ),
        compiler_params=pltpu.CompilerParams(
            dimension_semantics=("parallel", "parallel", "arbitrary"),
            vmem_limit_bytes=vmem_limit,
        ),
        cost_estimate=cost,
    )(xp, wp, bp)


class DenseLayerPallas:
    """Pallas-TPU DenseLayer: act(X @ W + b).

    Weights / bias are padded to tile-aligned shapes and (optionally) cast to
    the MXU operand dtype ONCE at construction, so per-call HBM traffic is
    just X in and S out (plus the weight stream read by the kernel itself).
    """

    def __init__(self, w, b, *, activation=None, compute_dtype=None, w_buffers=2):
        K, N = w.shape
        assert b.shape == (1, N), f"bias must be (1, {N}), got {b.shape}"
        assert activation in (None, "tanh", "relu")
        self.K, self.N = K, N
        self.activation = activation
        self.compute_dtype = compute_dtype
        self.w_buffers = w_buffers
        self._sub32 = (
            compute_dtype is not None and jnp.dtype(compute_dtype).itemsize < 4
        )

        Kp, Np, tk, tn = _pick_kn(K, N, self._sub32)
        self.Kp, self.Np, self.tk, self.tn = Kp, Np, tk, tn

        # Pad / cast once at init; skip pad entirely when already aligned.
        wp = w if (Kp == K and Np == N) else jnp.pad(w, ((0, Kp - K), (0, Np - N)))
        if compute_dtype is not None:
            wp = wp.astype(compute_dtype)
        bp = b if Np == N else jnp.pad(b, ((0, 0), (0, Np - N)))
        self.wp = wp
        self.bp = bp.astype(jnp.float32)

    def __call__(self, x):
        M, K = x.shape
        assert K == self.K
        Mp, tm = _pick_m(M, self._sub32)
        Kp, Np = self.Kp, self.Np

        # Only X needs per-call padding (zero-padding is mathematically inert).
        xp = x if (Mp == M and Kp == K) else jnp.pad(x, ((0, Mp - M), (0, Kp - K)))
        if self.compute_dtype is not None:
            xp = xp.astype(self.compute_dtype)

        out = _dense_matmul(
            xp, self.wp, self.bp, tm, self.tk, self.tn,
            activation=self.activation,
            w_buffers=self.w_buffers,
            logical_shape=(M, self.K, self.N),
        )
        if Mp != M or Np != self.N:
            out = out[:M, :self.N]
        return out


def dense_layer(x, w, b, *, activation=None, compute_dtype=None):
    """Functional convenience wrapper (builds the layer each call).

    For repeated forward passes construct DenseLayerPallas once instead so the
    weight padding / casting is not redone every call.
    """
    layer = DenseLayerPallas(w, b, activation=activation, compute_dtype=compute_dtype)
    return layer(x)


def _xavier_normal(key, fan_in, fan_out, dtype=jnp.float32):
    # Matches torch.nn.init.xavier_normal_ (gain=1): std = sqrt(2/(fan_in+fan_out))
    std = (2.0 / (fan_in + fan_out)) ** 0.5
    return std * jax.random.normal(key, (fan_in, fan_out), dtype=dtype)


if __name__ == "__main__":
    key = jax.random.PRNGKey(0)
    kx, kw, kx2, kw2 = jax.random.split(key, 4)

    # DGM-like shapes: batch=8, input_dim=32, output_dim=32.
    batch, input_dim, output_dim = 8, 32, 32
    x = jax.random.normal(kx, (batch, input_dim), dtype=jnp.float32)
    W = _xavier_normal(kw, input_dim, output_dim)
    b = jnp.zeros((1, output_dim), dtype=jnp.float32)

    # Layer object (weights padded/cast once), reused across calls.
    layer_tanh = DenseLayerPallas(W, b, activation="tanh")
    out = jax.block_until_ready(layer_tanh(x))
    ref = jnp.tanh(x @ W + b)
    assert out.shape == (batch, output_dim)
    assert jnp.allclose(out, ref, atol=1e-5, rtol=1e-5)
    out_again = jax.block_until_ready(layer_tanh(x))        # reuse path
    assert jnp.allclose(out_again, ref, atol=1e-5, rtol=1e-5)

    # identity and relu paths (functional wrapper).
    out_id = jax.block_until_ready(dense_layer(x, W, b, activation=None))
    assert jnp.allclose(out_id, x @ W + b, atol=1e-5, rtol=1e-5)
    out_relu = jax.block_until_ready(dense_layer(x, W, b, activation="relu"))
    assert jnp.allclose(out_relu, jnp.maximum(x @ W + b, 0.0), atol=1e-5, rtol=1e-5)

    # Non-tile-aligned shapes exercise the padding / slicing path.
    M2, K2, N2 = 37, 50, 33
    x2 = jax.random.normal(kx2, (M2, K2), dtype=jnp.float32)
    W2 = _xavier_normal(kw2, K2, N2)
    b2 = 0.1 * jnp.ones((1, N2), dtype=jnp.float32)
    out2 = jax.block_until_ready(dense_layer(x2, W2, b2, activation="tanh"))
    ref2 = jnp.tanh(x2 @ W2 + b2)
    assert out2.shape == (M2, N2)
    assert jnp.allclose(out2, ref2, atol=1e-4, rtol=1e-4)

    # bf16 MXU-operand path (v6e/v7x fast path); f32 accumulate/bias/tanh.
    layer_bf16 = DenseLayerPallas(W, b, activation="tanh", compute_dtype=jnp.bfloat16)
    out_bf16 = jax.block_until_ready(layer_bf16(x))
    assert jnp.allclose(out_bf16, ref, atol=5e-2, rtol=5e-2)

    print("KERNEL_OK")
</pallas_src>

<mosaic_0001>
module attributes {stable_mosaic.version = 11 : i64} {
  func.func @_dense_kernel(%arg0: i32, %arg1: i32, %arg2: i32, %arg3: memref<8x32xf32, #tpu.memory_space<vmem>>, %arg4: memref<32x128xf32, #tpu.memory_space<vmem>>, %arg5: memref<1x128xf32, #tpu.memory_space<vmem>>, %arg6: memref<8x128xf32, #tpu.memory_space<vmem>>) attributes {dimension_semantics = [#tpu.dimension_semantics<parallel>, #tpu.dimension_semantics<parallel>, #tpu.dimension_semantics<arbitrary>], iteration_bounds = array<i64: 1, 1, 1>, scalar_prefetch = 0 : i64, scratch_operands = 0 : i64, tpu.core_type = #tpu.core_type<tc>, window_params = [{transform_indices = @transform_0, window_bounds = array<i64: 8, 32>}, {transform_indices = @transform_1, window_bounds = array<i64: 32, 128>}, {transform_indices = @transform_2, window_bounds = array<i64: 1, 128>}, {transform_indices = @transform_3, window_bounds = array<i64: 8, 128>}]} {
    %c0_i32 = arith.constant 0 : i32
    %0 = arith.cmpi eq, %arg2, %c0_i32 : i32
    %1 = arith.extui %0 : i1 to i32
    %c0_i32_0 = arith.constant 0 : i32
    %2 = arith.cmpi ne, %1, %c0_i32_0 : i32
    scf.if %2 {
      %cst_10 = arith.constant 0.000000e+00 : f32
      %12 = vector.broadcast %cst_10 : f32 to vector<8x128xf32>
      %c0_11 = arith.constant 0 : index
      %c0_12 = arith.constant 0 : index
      %13 = vector.load %arg6[%c0_11, %c0_12] : memref<8x128xf32, #tpu.memory_space<vmem>>, vector<8x128xf32>
      tpu.vector_store %arg6[%c0_11, %c0_12], %12 {strides = array<i32>} : memref<8x128xf32, #tpu.memory_space<vmem>>, vector<8x128xf32>,
    } else {
    }
    %c0 = arith.constant 0 : index
    %c0_1 = arith.constant 0 : index
    %3 = vector.load %arg6[%c0, %c0_1] : memref<8x128xf32, #tpu.memory_space<vmem>>, vector<8x128xf32>
    %c0_2 = arith.constant 0 : index
    %c0_3 = arith.constant 0 : index
    %4 = vector.load %arg3[%c0_2, %c0_3] : memref<8x32xf32, #tpu.memory_space<vmem>>, vector<8x32xf32>
    %c0_4 = arith.constant 0 : index
    %c0_5 = arith.constant 0 : index
    %5 = vector.load %arg4[%c0_4, %c0_5] : memref<32x128xf32, #tpu.memory_space<vmem>>, vector<32x128xf32>
    %cst = arith.constant dense<0.000000e+00> : vector<8x128xf32>
    %6 = tpu.matmul %4, %5, %cst {dimension_numbers = #tpu.dot_dimension_numbers<[1], [0], [0], [1], [0, 0, 1, 1], [], []>} : vector<8x32xf32>, vector<32x128xf32>, vector<8x128xf32> -> vector<8x128xf32>
    %7 = arith.addf %3, %6 : vector<8x128xf32>
    %c0_6 = arith.constant 0 : index
    %c0_7 = arith.constant 0 : index
    %8 = vector.load %arg6[%c0_6, %c0_7] : memref<8x128xf32, #tpu.memory_space<vmem>>, vector<8x128xf32>
    tpu.vector_store %arg6[%c0_6, %c0_7], %7 {strides = array<i32>} : memref<8x128xf32, #tpu.memory_space<vmem>>, vector<8x128xf32>,
    %c0_i32_8 = arith.constant 0 : i32
    %9 = arith.cmpi eq, %arg2, %c0_i32_8 : i32
    %10 = arith.extui %9 : i1 to i32
    %c0_i32_9 = arith.constant 0 : i32
    %11 = arith.cmpi ne, %10, %c0_i32_9 : i32
    scf.if %11 {
      %c0_10 = arith.constant 0 : index
      %c0_11 = arith.constant 0 : index
      %12 = vector.load %arg6[%c0_10, %c0_11] : memref<8x128xf32, #tpu.memory_space<vmem>>, vector<8x128xf32>
      %c0_12 = arith.constant 0 : index
      %c0_13 = arith.constant 0 : index
      %13 = vector.load %arg5[%c0_12, %c0_13] : memref<1x128xf32, #tpu.memory_space<vmem>>, vector<1x128xf32>
      %14 = vector.broadcast %13 : vector<1x128xf32> to vector<8x128xf32>
      %15 = arith.addf %12, %14 : vector<8x128xf32>
      %16 = math.tanh %15 : vector<8x128xf32>
      %c0_14 = arith.constant 0 : index
      %c0_15 = arith.constant 0 : index
      %17 = vector.load %arg6[%c0_14, %c0_15] : memref<8x128xf32, #tpu.memory_space<vmem>>, vector<8x128xf32>
      tpu.vector_store %arg6[%c0_14, %c0_15], %16 {strides = array<i32>} : memref<8x128xf32, #tpu.memory_space<vmem>>, vector<8x128xf32>,
    } else {
    }
    return
  }
  func.func @transform_0(%arg0: i32, %arg1: i32, %arg2: i32) -> (i32, i32) {
    %c0_i32 = arith.constant 0 : i32
    return %arg0, %arg2 : i32, i32
  }
  func.func @transform_1(%arg0: i32, %arg1: i32, %arg2: i32) -> (i32, i32) {
    %c0_i32 = arith.constant 0 : i32
    return %arg2, %arg1 : i32, i32
  }
  func.func @transform_2(%arg0: i32, %arg1: i32, %arg2: i32) -> (i32, i32) {
    %c0_i32 = arith.constant 0 : i32
    %c0_i32_0 = arith.constant 0 : i32
    return %c0_i32, %arg1 : i32, i32
  }
  func.func @transform_3(%arg0: i32, %arg1: i32, %arg2: i32) -> (i32, i32) {
    %c0_i32 = arith.constant 0 : i32
    return %arg0, %arg1 : i32, i32
  }
}

</mosaic_0001>

<bundles_post_ra>
// kernel: tpu_custom_call.1
= control target key start
LH: loop header
LB: loop body
LE: loop exit
PB: predicated region body
PF: predicated region fallthrough
CT: control target
= control target key end

     0   :  { %8 = vsyncpa [#allocation3], 0  ;;  %s290_s0 = inlined_call_operand.hbm [shape: f32[8,32], index: 0, kind: input, shape index: {}]   ;;  %s291_s1 = inlined_call_operand.hbm [shape: f32[32,128], index: 1, kind: input, shape index: {}]   ;;  %s292_s2 = inlined_call_operand.vmem [shape: f32[1,128], index: 2, kind: input, shape index: {}]   ;;  %s293_s3 = inlined_call_operand.hbm [shape: f32[8,128], index: 3, kind: output, shape index: {}]  }
   0x1   :  { %9 = vsyncpa [#allocation6], 0 }
   0x2   :  { %10 = vsyncpa [#allocation4], 0  ;;  %s251_s12 = smov [#allocation2]   ;;  %s252_s14 = smov [#allocation5]  }
   0x3   :  { %s17_s13 = sshll.u32 %s251_s12, 4  ;;  %s26_s15 = sshll.u32 %s252_s14, 4  ;;  %s18_s13 = int_to_ptr.vmem [resolvable:$true] %s17_s13  ;;  %s27_s15 = int_to_ptr.vmem [resolvable:$true] %s26_s15 }
   0x4   :  { %s193_s16 = scalar_lea.vmem %s18_s13, 128  ;;  %p198_p1 = scmp.lt.s32.totalorder %s18_s13, %s18_s13 }
   0x5   :  { %p194_p0 = scmp.ne.s32.totalorder %s18_s13, %s193_s16  ;;  %p199_p2 = scmp.lt.s32.totalorder %s193_s16, %s193_s16 }
   0x7   :  { %p200_p3 = por %p199_p2, %p198_p1 }
   0x9   :  { %p201_p4 = pnand %p200_p3, %p194_p0 }
   0xb   :  { %204 = shalt.err (!%p201_p4)
}
   0xc   :  { %20 = dma.hbm_to_vmem [thread:$0]  %s290_s0, 128, %s18_s13, [#allocation3]  }
   0xd   :  { %s213_s19 = scalar_lea.vmem %s27_s15, 512  ;;  %p218_p6 = scmp.lt.s32.totalorder %s27_s15, %s27_s15 }
   0xe   :  { %p214_p5 = scmp.ne.s32.totalorder %s27_s15, %s213_s19  ;;  %p219_p7 = scmp.lt.s32.totalorder %s213_s19, %s213_s19 }
  0x10   :  { %p220_p8 = por %p219_p7, %p218_p6 }
  0x12   :  { %p221_p9 = pnand %p220_p8, %p214_p5 }
  0x14   :  { %224 = shalt.err (!%p221_p9)
}
  0x15   :  { %s253_s20 = smov 128   ;;  %s254_s21 = smov 8  }
  0x16   :  { %32 = dma.hbm_to_vmem [thread:$0]  %s291_s1, 512, %s27_s15, [#allocation6], %s253_s20, %s253_s20, %s254_s21  }
  0x17   :  { %245 = dma.done.wait [#allocation3], 128  }
  0x18   :  { %246 = vsyncadd [#allocation3], 4294967168 }
  0x19   :  { %247 = dma.done.wait [#allocation6], 512  }
  0x1a   :  { %248 = vsyncadd [#allocation6], 4294966784  ;;  %v255_v0 = vmov 0.0   ;;  %vm256_vm0 = vmmov 0   ;;  %v51_v1 = vld [vmem:[#allocation5 + $0x18] sm:$0xff]  ;;  %v50_v2 = vld [vmem:[#allocation5 + $0x10] sm:$0xff] }
  0x1b   :  { %165 = vmatprep.subr.mxu0 %v255_v0  ;;  %173 = vmatprep.mubr.msk.f32.mxu0 %vm256_vm0, %v255_v0  ;;  %v49_v3 = vld [vmem:[#allocation5 + $0x8] sm:$0xff]  ;;  %v48_v4 = vld [vmem:[#allocation5] sm:$0xff]  ;;  %v47_v5 = vld [vmem:[#allocation2] sm:$0xff]  ;;  %vm52_vm1 = vcmask 261120   ;;  %s257_s24 = smov [#allocation7]  }
  0x1c   :  { %166 = vmatpush3.msra.mxu0 %v51_v1  ;;  %v159_v7 = vld [vmem:[%s292_s2] ss:$0 sm:$0xff]  ;;  %s148_s25 = sshll.u32 %s257_s24, 4  ;;  %s149_s25 = int_to_ptr.vmem [resolvable:$true] %s148_s25 }
  0x1d   :  { %167 = vmatprep.subr.mxu0 %v255_v0  ;;  %s225_s26 = scalar_lea.vmem %s149_s25, 128  ;;  %p230_p11 = scmp.lt.s32.totalorder %s149_s25, %s149_s25 }
  0x1e   :  { %168 = vmatpush3.msra.mxu0 %v50_v2  ;;  %p226_p10 = scmp.ne.s32.totalorder %s149_s25, %s225_s26  ;;  %p231_p12 = scmp.lt.s32.totalorder %s225_s26, %s225_s26 }
  0x1f   :  { %169 = vmatprep.subr.mxu0 %v255_v0 }
  0x20   :  { %170 = vmatpush3.msra.mxu0 %v49_v3  ;;  %p232_p13 = por %p231_p12, %p230_p11 }
  0x21   :  { %171 = vmatprep.subr.mxu0 %v255_v0 }
  0x22   :  { %172 = vmatpush3.msra.mxu0 %v48_v4  ;;  %p233_p0 = pnand %p232_p13, %p226_p10 }
  0x23   :  { %174 = vmatmul.mubr.msk.f32.vlgmr.msra.gmra.mxu0 %vm52_vm1, %v47_v5 }
  0xe3   :  { %v122_v6 = vpop.f32.mrf.mxu0 }
  0xe4   :  { %v139_v9 = vadd.f32 %v159_v7, %v122_v6 }
  0xe5   :  { %v175_v8 = vpop.f32.mrf.mxu0 }
  0xe6   :  { %183 = vtanh.f32 %v139_v9 }
  0xf3   :  { %v184_v10 = vpop.eup %183 }
  0xf4   :  { %141 = vst [vmem:[#allocation7] sm:$0xff] %v184_v10 }
  0xf5   :  { %236 = shalt.err (!%p233_p0)
}
  0xf6   :  { %151 = dma.vmem_to_hbm [thread:$0]  %s149_s25, 128, %s293_s3, [#allocation4]  }
  0xf7   :  { %249 = dma.done.wait [#allocation4], 128  }
  0xf8   :  { %250 = vsyncadd [#allocation4], 4294967168 }
  0xf9   :  { %155 = vsyncpa [#allocation3], 1 }
  0xfa   :  { %156 = vsyncpa [#allocation6], 1 }
  0xfb   :  { %157 = vsyncpa [#allocation4], 1 }

</bundles_post_ra>
